<compile_context>
chip_gen: v5e
topology: v5e:2x2
jax: 0.10.0
libtpu: 0.0.40
codegen_flags: <defaults>
</compile_context>

<pallas_src>
import jax
import jax.numpy as jnp
from jax.experimental import pallas as pl
from jax.experimental.pallas import tpu as pltpu

_LANES = 128


def _round_up(x, m):
    return ((x + m - 1) // m) * m


def gather_relu_kernel(idx_ref, alpha_ref, out_ref):
    """out[r, l] = relu(alpha[idx[r, l]]) via lane gathers over 128-wide chunks."""
    idx = idx_ref[...]                                   # (TM, 128) int32
    tm, lanes = idx.shape
    n_chunks = alpha_ref.shape[-1] // lanes              # ceil(N / 128), static

    result = jnp.zeros((tm, lanes), jnp.float32)
    for c in range(n_chunks):                            # static unroll
        chunk = alpha_ref[:, c * lanes:(c + 1) * lanes]  # (1, 128) f32
        chunk_b = jnp.broadcast_to(chunk, (tm, lanes))   # cheap sublane broadcast
        local = idx - c * lanes
        in_chunk = (local >= 0) & (local < lanes)
        local_safe = jnp.clip(local, 0, lanes - 1)
        # per-row lane gather: lowers to tpu.dynamic_gather (no one-hot reduce)
        vals = jnp.take_along_axis(chunk_b, local_safe, axis=-1,
                                   mode="promise_in_bounds")
        result = jnp.where(in_chunk, vals, result)

    out_ref[...] = jnp.maximum(result, 0.0)              # ReLU


def attention_params_forward(alpha, idx, *, block_rows=1024):
    """JAX wrapper reproducing attention_params.forward(idx) = relu(alpha[idx])."""
    orig_shape = idx.shape
    idx_flat = jnp.ravel(idx).astype(jnp.int32)
    m = idx_flat.shape[0]
    n = alpha.shape[0]

    n_pad = _round_up(n, _LANES)                 # alpha padded to whole lanes
    rows = pl.cdiv(m, _LANES)
    tm = min(block_rows, _round_up(rows, 8))     # block rows, multiple of 8
    rows_pad = _round_up(rows, tm)               # grid divides evenly
    m_pad = rows_pad * _LANES

    idx2d = jnp.pad(idx_flat, (0, m_pad - m)).reshape(rows_pad, _LANES)
    alpha2d = jnp.pad(alpha.astype(jnp.float32), (0, n_pad - n)).reshape(1, n_pad)

    out = pl.pallas_call(
        gather_relu_kernel,
        out_shape=jax.ShapeDtypeStruct((rows_pad, _LANES), jnp.float32),
        grid=(rows_pad // tm,),
        in_specs=[
            pl.BlockSpec((tm, _LANES), lambda i: (i, 0)),   # idx tiles, pipelined
            pl.BlockSpec((1, n_pad), lambda i: (0, 0)),     # alpha: VMEM-resident
        ],
        out_specs=pl.BlockSpec((tm, _LANES), lambda i: (i, 0)),
        compiler_params=pltpu.CompilerParams(
            dimension_semantics=("parallel",)),
    )(idx2d, alpha2d)

    return out.reshape(-1)[:m].reshape(orig_shape)


if __name__ == "__main__":
    key = jax.random.PRNGKey(0)
    k_idx, k_alpha, k_idx2, k_idx3 = jax.random.split(key, 4)

    # Module parameter: alpha = ones(N), exactly as in __init__.
    N = 32
    alpha = jnp.ones((N,), dtype=jnp.float32)
    idx = jax.random.randint(k_idx, shape=(2, 8), minval=0, maxval=N, dtype=jnp.int32)

    probs = attention_params_forward(alpha, idx)
    probs = jax.block_until_ready(probs)
    ref = jnp.maximum(alpha[idx], 0.0)
    assert probs.shape == idx.shape
    assert jnp.allclose(probs, ref), "mismatch vs reference (alpha = ones)"

    # Non-trivial (signed) alpha to exercise both the gather and the ReLU.
    alpha_rnd = jax.random.normal(k_alpha, (N,), dtype=jnp.float32)
    idx2 = jax.random.randint(k_idx2, shape=(3, 5, 8), minval=0, maxval=N,
                              dtype=jnp.int32)
    out2 = jax.block_until_ready(attention_params_forward(alpha_rnd, idx2))
    ref2 = jnp.maximum(alpha_rnd[idx2], 0.0)
    assert jnp.allclose(out2, ref2), "mismatch vs reference (random alpha)"

    # N > 128 exercises the multi-chunk gather path.
    N3 = 300
    alpha3 = jax.random.normal(k_alpha, (N3,), dtype=jnp.float32)
    idx3 = jax.random.randint(k_idx3, shape=(4, 16), minval=0, maxval=N3,
                              dtype=jnp.int32)
    out3 = jax.block_until_ready(attention_params_forward(alpha3, idx3))
    ref3 = jnp.maximum(alpha3[idx3], 0.0)
    assert jnp.allclose(out3, ref3), "mismatch vs reference (N > 128)"

    print("KERNEL_OK")
</pallas_src>

<mosaic_0001>
module attributes {stable_mosaic.version = 11 : i64} {
  func.func @gather_relu_kernel(%arg0: i32, %arg1: memref<8x128xi32, #tpu.memory_space<vmem>>, %arg2: memref<1x128xf32, #tpu.memory_space<vmem>>, %arg3: memref<8x128xf32, #tpu.memory_space<vmem>>) attributes {dimension_semantics = [#tpu.dimension_semantics<parallel>], iteration_bounds = array<i64: 1>, scalar_prefetch = 0 : i64, scratch_operands = 0 : i64, tpu.core_type = #tpu.core_type<tc>, window_params = [{transform_indices = @transform_0, window_bounds = array<i64: 8, 128>}, {pipeline_mode = #tpu.pipeline_mode<synchronous>, transform_indices = @transform_1, window_bounds = array<i64: 1, 128>}, {transform_indices = @transform_2, window_bounds = array<i64: 8, 128>}]} {
    %c0 = arith.constant 0 : index
    %c0_0 = arith.constant 0 : index
    %0 = vector.load %arg1[%c0, %c0_0] : memref<8x128xi32, #tpu.memory_space<vmem>>, vector<8x128xi32>
    %cst = arith.constant 0.000000e+00 : f32
    %1 = vector.broadcast %cst : f32 to vector<8x128xf32>
    %c0_1 = arith.constant 0 : index
    %c0_2 = arith.constant 0 : index
    %2 = vector.load %arg2[%c0_1, %c0_2] : memref<1x128xf32, #tpu.memory_space<vmem>>, vector<1x128xf32>
    %3 = vector.shape_cast %2 : vector<1x128xf32> to vector<1x128xf32>
    %4 = vector.broadcast %3 : vector<1x128xf32> to vector<8x128xf32>
    %c0_i32 = arith.constant 0 : i32
    %5 = vector.broadcast %c0_i32 : i32 to vector<8x128xi32>
    %6 = arith.subi %0, %5 : vector<8x128xi32>
    %c0_i32_3 = arith.constant 0 : i32
    %7 = vector.broadcast %c0_i32_3 : i32 to vector<8x128xi32>
    %8 = arith.cmpi sge, %6, %7 : vector<8x128xi32>
    %c128_i32 = arith.constant 128 : i32
    %9 = vector.broadcast %c128_i32 : i32 to vector<8x128xi32>
    %10 = arith.cmpi slt, %6, %9 : vector<8x128xi32>
    %11 = arith.andi %8, %10 : vector<8x128xi1>
    %c0_i32_4 = arith.constant 0 : i32
    %c127_i32 = arith.constant 127 : i32
    %12 = vector.broadcast %c0_i32_4 : i32 to vector<8x128xi32>
    %13 = arith.maxsi %12, %6 : vector<8x128xi32>
    %14 = vector.broadcast %c127_i32 : i32 to vector<8x128xi32>
    %15 = arith.minsi %14, %13 : vector<8x128xi32>
    %16 = vector.shape_cast %15 : vector<8x128xi32> to vector<8x128x1xi32>
    %17 = vector.shape_cast %16 : vector<8x128x1xi32> to vector<8x128xi32>
    %18 = tpu.dynamic_gather %4[%17] in [1] : vector<8x128xf32>, vector<8x128xi32> -> vector<8x128xf32>
    %19 = arith.select %11, %18, %1 : vector<8x128xi1>, vector<8x128xf32>
    %cst_5 = arith.constant 0.000000e+00 : f32
    %20 = vector.broadcast %cst_5 : f32 to vector<8x128xf32>
    %21 = arith.maximumf %19, %20 : vector<8x128xf32>
    %c0_6 = arith.constant 0 : index
    %c0_7 = arith.constant 0 : index
    %22 = vector.load %arg3[%c0_6, %c0_7] : memref<8x128xf32, #tpu.memory_space<vmem>>, vector<8x128xf32>
    tpu.vector_store %arg3[%c0_6, %c0_7], %21 {strides = array<i32>} : memref<8x128xf32, #tpu.memory_space<vmem>>, vector<8x128xf32>,
    return
  }
  func.func @transform_0(%arg0: i32) -> (i32, i32) {
    %c0_i32 = arith.constant 0 : i32
    %c0_i32_0 = arith.constant 0 : i32
    return %arg0, %c0_i32 : i32, i32
  }
  func.func @transform_1(%arg0: i32) -> (i32, i32) {
    %c0_i32 = arith.constant 0 : i32
    %c0_i32_0 = arith.constant 0 : i32
    %c0_i32_1 = arith.constant 0 : i32
    return %c0_i32, %c0_i32_0 : i32, i32
  }
  func.func @transform_2(%arg0: i32) -> (i32, i32) {
    %c0_i32 = arith.constant 0 : i32
    %c0_i32_0 = arith.constant 0 : i32
    return %arg0, %c0_i32 : i32, i32
  }
}

</mosaic_0001>

<bundles_post_ra>
// kernel: tpu_custom_call.1
= control target key start
LH: loop header
LB: loop body
LE: loop exit
PB: predicated region body
PF: predicated region fallthrough
CT: control target
= control target key end

     0   :  { %7 = vsyncpa [#allocation3], 0  ;;  %s186_s0 = inlined_call_operand.hbm [shape: s32[8,128], index: 0, kind: input, shape index: {}]   ;;  %s187_s1 = inlined_call_operand.hbm [shape: f32[1,128], index: 1, kind: input, shape index: {}]   ;;  %s188_s2 = inlined_call_operand.hbm [shape: f32[8,128], index: 2, kind: output, shape index: {}]  }
   0x1   :  { %8 = vsyncpa [#allocation6], 0 }
   0x2   :  { %9 = vsyncpa [#allocation4], 0  ;;  %s15_s11 = sshll.u32 %s186_s0, 4  ;;  %s159_s12 = smov [#allocation2]   ;;  %s16_s11 = int_to_ptr.hbm [resolvable:$true] %s15_s11 }
   0x3   :  { %s17_s13 = sshll.u32 %s159_s12, 4  ;;  %s26_s16 = sshll.u32 %s187_s1, 4  ;;  %s18_s13 = int_to_ptr.vmem [resolvable:$true] %s17_s13  ;;  %s27_s16 = int_to_ptr.hbm [resolvable:$true] %s26_s16 }
   0x4   :  { %20 = dma.hbm_to_vmem [thread:$0]  %s16_s11, 128, %s18_s13, [#allocation3]  }
   0x5   :  { %s160_s17 = smov [#allocation5]  }
   0x6   :  { %s28_s18 = sshll.u32 %s160_s17, 4  ;;  %s29_s18 = int_to_ptr.vmem [resolvable:$true] %s28_s18 }
   0x7   :  { %31 = dma.hbm_to_vmem [thread:$0]  %s27_s16, 16, %s29_s18, [#allocation6]  }
   0x8   :  { %153 = dma.done.wait [#allocation3], 128  }
   0x9   :  { %154 = vsyncadd [#allocation3], 4294967168 }
   0xa   :  { %155 = dma.done.wait [#allocation6], 16  }
   0xb   :  { %156 = vsyncadd [#allocation6], 4294967280  ;;  %v40_v0 = vld [vmem:[#allocation2] sm:$0xff]  ;;  %v80_v3 = vld [vmem:[#allocation5] ss:$0 sm:$0xff]  ;;  %s161_s0 = smov [#allocation7]  }
   0xc   :  { %vm48_vm0 = vcmp.gt.s32.totalorder %v40_v0, 0  ;;  %vm45_vm2 = vcmp.ge.s32.totalorder %v40_v0, 0  ;;  %vm46_vm3 = vcmp.lt.s32.totalorder %v40_v0, 128  ;;  %s63_s1 = sshll.u32 %s161_s0, 4  ;;  %s65_s21 = sshll.u32 %s188_s2, 4  ;;  %s64_s1 = int_to_ptr.vmem [resolvable:$true] %s63_s1  ;;  %s66_s21 = int_to_ptr.hbm [resolvable:$true] %s65_s21 }
   0xd   :  { %v49_v1 = vsel %vm48_vm0, %v40_v0, 0  ;;  %vm47_vm4 = vmand %vm45_vm2, %vm46_vm3 }
   0xe   :  { %vm50_vm1 = vcmp.lt.s32.totalorder %v49_v1, 127 }
   0xf   :  { %v51_v2 = vsel %vm50_vm1, %v49_v1, 127 }
  0x10   :  { %79 = vset.pattern.permute.xlu0 %v51_v2 }
  0x18   :  { %53 = vperm.xlu0 %79, %v80_v3  }
  0x8a   :  { %v54_v4 = vpop.permute.xlu0 %53 }
  0x8b   :  { %v55_v5 = vsel %vm47_vm4, %v54_v4, 0.0 }
  0x8c   :  { %v56_v6 = vmax.f32 %v55_v5, 0.0 }
  0x8e   :  { %57 = vst [vmem:[#allocation7] sm:$0xff] %v56_v6 }
  0x8f   :  { %68 = dma.vmem_to_hbm [thread:$0]  %s64_s1, 128, %s66_s21, [#allocation4]  }
  0x90   :  { %157 = dma.done.wait [#allocation4], 128  }
  0x91   :  { %158 = vsyncadd [#allocation4], 4294967168 }
  0x92   :  { %73 = vsyncpa [#allocation3], 1 }
  0x93   :  { %74 = vsyncpa [#allocation6], 1 }
  0x94   :  { %75 = vsyncpa [#allocation4], 1 }

</bundles_post_ra>
